<compile_context>
chip_gen: v6e
topology: v6e:2x2x1
jax: 0.10.0
libtpu: 0.0.40
codegen_flags: <defaults>
</compile_context>

<pallas_src>
import jax
import jax.numpy as jnp
from jax import lax
from jax.experimental import pallas as pl
from jax.experimental.pallas import tpu as pltpu


def _round_up(n: int, m: int) -> int:
    return ((n + m - 1) // m) * m


def pred_layer_kernel(x_ref, w1_ref, w2_ref, b2_ref, w3_ref, b3_ref,
                      w4_ref, b4_ref, o_ref):
    """One batch tile: x (tile_b, F) bf16 -> sigmoid outputs as a (1, tile_b) row."""
    bf16 = jnp.bfloat16
    x = x_ref[...]                                                # (tile_b, F) bf16

    # Layer 1: Linear(F, D1, bias=False) + ReLU   (MXU, f32 accumulation)
    h1 = jnp.maximum(
        jnp.dot(x, w1_ref[...], preferred_element_type=jnp.float32), 0.0)

    # Layer 2: Linear(D1, D2) + ReLU
    h2 = jnp.maximum(
        jnp.dot(h1.astype(bf16), w2_ref[...],
                preferred_element_type=jnp.float32) + b2_ref[...], 0.0)

    # Layer 3: Linear(D2, D3) + ReLU
    h3 = jnp.maximum(
        jnp.dot(h2.astype(bf16), w3_ref[...],
                preferred_element_type=jnp.float32) + b3_ref[...], 0.0)

    # Layer 4: Linear(D3, 1).  w4 arrives as an (8, D3) row block (row 0 is the
    # real weight row, rows 1..7 are zero padding for sublane alignment).
    # Contracting the D3 axes of both operands gives the logits as a lane-dense
    # ROW (batch on the lane axis) -> full-lane output stores, no transpose.
    logits8 = lax.dot_general(
        w4_ref[...], h3.astype(bf16),
        dimension_numbers=(((1,), (1,)), ((), ())),
        preferred_element_type=jnp.float32)                       # (8, tile_b)
    logits = logits8[0:1, :] + b4_ref[...]                        # (1, tile_b)

    # Numerically stable sigmoid (no inf intermediates); divide on the EUP.
    ez = jnp.exp(-jnp.abs(logits))                                # in (0, 1]
    inv = pl.reciprocal(1.0 + ez, approx=True)                    # ~ 1 / (1 + ez)
    sig = jnp.where(logits >= 0.0, inv, ez * inv)

    o_ref[...] = sig.astype(o_ref.dtype)                          # (1, tile_b)


def pred_layer_forward(x, params, *, tile_b=None):
    """Fused PredLayer forward.

    x:      (B, F) float32 (or bfloat16 for the full bandwidth win).
    params: dict of float32 arrays: w1 (F,D1), w2 (D1,D2), b2 (1,D2),
            w3 (D2,D3), b3 (1,D3), w4 (D3,1), b4 (1,1)  (weights stored (in,out)).
    Returns (B, 1) float32.
    """
    B, F = x.shape
    w1, w2, b2, w3, b3, w4, b4 = (params[k] for k in
                                  ("w1", "w2", "b2", "w3", "b3", "w4", "b4"))
    D1, D2, D3 = w1.shape[1], w2.shape[1], w3.shape[1]

    if tile_b is None:
        # Large enough to amortize the ~0.35us per-grid-step overhead, small
        # enough to keep VMEM modest, and >= 2 grid steps whenever B allows it
        # (so v7x's two TensorCores both get work).
        tile_b = max(128, min(4096, _round_up((B + 1) // 2, 128)))
    if tile_b % 128 != 0:
        raise ValueError(f"tile_b must be a multiple of 128, got {tile_b}")

    B_pad = _round_up(B, tile_b)
    num_tiles = B_pad // tile_b

    bf16 = jnp.bfloat16
    # bf16 streams (in a real pipeline, produce x in bf16 upstream to avoid the
    # extra cast pass); f32 accumulation happens inside the kernel.
    xb = x.astype(bf16)
    if B_pad != B:
        xb = jnp.pad(xb, ((0, B_pad - B), (0, 0)))
    w1b, w2b, w3b = w1.astype(bf16), w2.astype(bf16), w3.astype(bf16)
    # Final-layer weight as a sublane-aligned (8, D3) row block (row 0 real).
    w4p = jnp.pad(w4.reshape(1, D3).astype(bf16), ((0, 7), (0, 0)))
    b2f, b3f, b4f = (b.astype(jnp.float32) for b in (b2, b3, b4))

    full = lambda shape: pl.BlockSpec(shape, lambda i: (0, 0))

    out = pl.pallas_call(
        pred_layer_kernel,
        out_shape=jax.ShapeDtypeStruct((num_tiles, 1, tile_b), jnp.float32),
        grid_spec=pltpu.PrefetchScalarGridSpec(
            num_scalar_prefetch=0,
            grid=(num_tiles,),
            in_specs=[
                pl.BlockSpec((tile_b, F), lambda i: (i, 0)),  # x tile (pipelined)
                full((F, D1)),                                # w1 (VMEM-resident)
                full((D1, D2)),                               # w2
                full((1, D2)),                                # b2
                full((D2, D3)),                               # w3
                full((1, D3)),                                # b3
                full((8, D3)),                                # w4 padded row block
                full((1, 1)),                                 # b4
            ],
            # Lane-dense output slab: one full-lane (1, tile_b) row per step.
            out_specs=pl.BlockSpec((None, 1, tile_b), lambda i: (i, 0, 0)),
        ),
        compiler_params=pltpu.CompilerParams(
            dimension_semantics=("parallel",)),
    )(xb, w1b, w2b, b2f, w3b, b3f, w4p, b4f)

    # (num_tiles, 1, tile_b) -> (B_pad, 1) -> drop batch padding.
    return out.reshape(B_pad, 1)[:B]


def init_params(key, input_feas_dim, dim1, dim2, dim3):
    """Deterministic synthetic init. Weights stored as (in, out)."""
    ks = jax.random.split(key, 7)
    scale = 0.1
    return {
        "w1": scale * jax.random.normal(ks[0], (input_feas_dim, dim1), jnp.float32),
        "w2": scale * jax.random.normal(ks[1], (dim1, dim2), jnp.float32),
        "b2": scale * jax.random.normal(ks[2], (1, dim2), jnp.float32),
        "w3": scale * jax.random.normal(ks[3], (dim2, dim3), jnp.float32),
        "b3": scale * jax.random.normal(ks[4], (1, dim3), jnp.float32),
        "w4": scale * jax.random.normal(ks[5], (dim3, 1), jnp.float32),
        "b4": scale * jax.random.normal(ks[6], (1, 1), jnp.float32),
    }


def pred_layer_ref_f32(x, p):
    """Exact float32 reference (PyTorch semantics)."""
    h1 = jnp.maximum(x @ p["w1"], 0.0)
    h2 = jnp.maximum(h1 @ p["w2"] + p["b2"], 0.0)
    h3 = jnp.maximum(h2 @ p["w3"] + p["b3"], 0.0)
    return jax.nn.sigmoid(h3 @ p["w4"] + p["b4"])


def pred_layer_ref_bf16(x, p):
    """Pure-JAX reference replicating the kernel's bf16-stream / f32-accum math."""
    bf16, f32 = jnp.bfloat16, jnp.float32
    xb = x.astype(bf16)
    w1, w2, w3, w4 = (p[k].astype(bf16) for k in ("w1", "w2", "w3", "w4"))
    h1 = jnp.maximum(jnp.dot(xb, w1, preferred_element_type=f32), 0.0)
    h2 = jnp.maximum(jnp.dot(h1.astype(bf16), w2, preferred_element_type=f32)
                     + p["b2"], 0.0)
    h3 = jnp.maximum(jnp.dot(h2.astype(bf16), w3, preferred_element_type=f32)
                     + p["b3"], 0.0)
    logits = jnp.dot(h3.astype(bf16), w4, preferred_element_type=f32) + p["b4"]
    return jax.nn.sigmoid(logits)


if __name__ == "__main__":
    key = jax.random.PRNGKey(0)
    k_x, k_p = jax.random.split(key)

    # Small shapes consistent with PredLayer(F=32, D1=64, D2=32, D3=16).
    # B=500 is deliberately not a multiple of the tile (exercises padding);
    # tile_b=128 gives a 4-step pipelined grid (megacore-shardable on v7x).
    B, F, D1, D2, D3 = 500, 32, 64, 32, 16
    x = jax.random.normal(k_x, (B, F), jnp.float32)
    params = init_params(k_p, F, D1, D2, D3)

    out = pred_layer_forward(x, params, tile_b=128)
    out = jax.block_until_ready(out)

    assert out.shape == (B, 1)
    assert bool(jnp.all(jnp.isfinite(out)))

    ref_b = pred_layer_ref_bf16(x, params)   # same bf16/f32 math as the kernel
    ref_f = pred_layer_ref_f32(x, params)    # exact PyTorch-equivalent f32 math
    assert jnp.allclose(out, ref_b, atol=1e-2, rtol=0.0), \
        float(jnp.max(jnp.abs(out - ref_b)))
    assert jnp.allclose(out, ref_f, atol=3e-2, rtol=0.0), \
        float(jnp.max(jnp.abs(out - ref_f)))

    print("KERNEL_OK")
</pallas_src>

<mosaic_0001>
module attributes {stable_mosaic.version = 11 : i64} {
  func.func @pred_layer_kernel(%arg0: i32, %arg1: memref<128x32xbf16, #tpu.memory_space<vmem>>, %arg2: memref<32x64xbf16, #tpu.memory_space<vmem>>, %arg3: memref<64x32xbf16, #tpu.memory_space<vmem>>, %arg4: memref<1x32xf32, #tpu.memory_space<vmem>>, %arg5: memref<32x16xbf16, #tpu.memory_space<vmem>>, %arg6: memref<1x16xf32, #tpu.memory_space<vmem>>, %arg7: memref<8x16xbf16, #tpu.memory_space<vmem>>, %arg8: memref<1x1xf32, #tpu.memory_space<vmem>>, %arg9: memref<1x1x128xf32, #tpu.memory_space<vmem>>) attributes {dimension_semantics = [#tpu.dimension_semantics<parallel>], iteration_bounds = array<i64: 4>, scalar_prefetch = 0 : i64, scratch_operands = 0 : i64, tpu.core_type = #tpu.core_type<tc>, window_params = [{transform_indices = @transform_0, window_bounds = array<i64: 128, 32>}, {pipeline_mode = #tpu.pipeline_mode<synchronous>, transform_indices = @transform_1, window_bounds = array<i64: 32, 64>}, {pipeline_mode = #tpu.pipeline_mode<synchronous>, transform_indices = @transform_2, window_bounds = array<i64: 64, 32>}, {pipeline_mode = #tpu.pipeline_mode<synchronous>, transform_indices = @transform_3, window_bounds = array<i64: 1, 32>}, {pipeline_mode = #tpu.pipeline_mode<synchronous>, transform_indices = @transform_4, window_bounds = array<i64: 32, 16>}, {pipeline_mode = #tpu.pipeline_mode<synchronous>, transform_indices = @transform_5, window_bounds = array<i64: 1, 16>}, {pipeline_mode = #tpu.pipeline_mode<synchronous>, transform_indices = @transform_6, window_bounds = array<i64: 8, 16>}, {pipeline_mode = #tpu.pipeline_mode<synchronous>, transform_indices = @transform_7, window_bounds = array<i64: 1, 1>}, {transform_indices = @transform_8, window_bounds = array<i64: 1, 1, 128>}]} {
    %c0 = arith.constant 0 : index
    %c0_0 = arith.constant 0 : index
    %0 = vector.load %arg1[%c0, %c0_0] : memref<128x32xbf16, #tpu.memory_space<vmem>>, vector<128x32xbf16>
    %c0_1 = arith.constant 0 : index
    %c0_2 = arith.constant 0 : index
    %1 = vector.load %arg2[%c0_1, %c0_2] : memref<32x64xbf16, #tpu.memory_space<vmem>>, vector<32x64xbf16>
    %cst = arith.constant dense<0.000000e+00> : vector<128x64xf32>
    %2 = tpu.matmul %0, %1, %cst {dimension_numbers = #tpu.dot_dimension_numbers<[1], [0], [0], [1], [0, 0, 1, 1], [], []>} : vector<128x32xbf16>, vector<32x64xbf16>, vector<128x64xf32> -> vector<128x64xf32>
    %cst_3 = arith.constant 0.000000e+00 : f32
    %3 = vector.broadcast %cst_3 : f32 to vector<128x64xf32>
    %4 = arith.maximumf %2, %3 : vector<128x64xf32>
    %5 = arith.truncf %4 : vector<128x64xf32> to vector<128x64xbf16>
    %c0_4 = arith.constant 0 : index
    %c0_5 = arith.constant 0 : index
    %6 = vector.load %arg3[%c0_4, %c0_5] : memref<64x32xbf16, #tpu.memory_space<vmem>>, vector<64x32xbf16>
    %cst_6 = arith.constant dense<0.000000e+00> : vector<128x32xf32>
    %7 = tpu.matmul %5, %6, %cst_6 {dimension_numbers = #tpu.dot_dimension_numbers<[1], [0], [0], [1], [0, 0, 1, 1], [], []>} : vector<128x64xbf16>, vector<64x32xbf16>, vector<128x32xf32> -> vector<128x32xf32>
    %c0_7 = arith.constant 0 : index
    %c0_8 = arith.constant 0 : index
    %8 = vector.load %arg4[%c0_7, %c0_8] : memref<1x32xf32, #tpu.memory_space<vmem>>, vector<1x32xf32>
    %9 = vector.broadcast %8 : vector<1x32xf32> to vector<128x32xf32>
    %10 = arith.addf %7, %9 : vector<128x32xf32>
    %cst_9 = arith.constant 0.000000e+00 : f32
    %11 = vector.broadcast %cst_9 : f32 to vector<128x32xf32>
    %12 = arith.maximumf %10, %11 : vector<128x32xf32>
    %13 = arith.truncf %12 : vector<128x32xf32> to vector<128x32xbf16>
    %c0_10 = arith.constant 0 : index
    %c0_11 = arith.constant 0 : index
    %14 = vector.load %arg5[%c0_10, %c0_11] : memref<32x16xbf16, #tpu.memory_space<vmem>>, vector<32x16xbf16>
    %cst_12 = arith.constant dense<0.000000e+00> : vector<128x16xf32>
    %15 = tpu.matmul %13, %14, %cst_12 {dimension_numbers = #tpu.dot_dimension_numbers<[1], [0], [0], [1], [0, 0, 1, 1], [], []>} : vector<128x32xbf16>, vector<32x16xbf16>, vector<128x16xf32> -> vector<128x16xf32>
    %c0_13 = arith.constant 0 : index
    %c0_14 = arith.constant 0 : index
    %16 = vector.load %arg6[%c0_13, %c0_14] : memref<1x16xf32, #tpu.memory_space<vmem>>, vector<1x16xf32>
    %17 = vector.broadcast %16 : vector<1x16xf32> to vector<128x16xf32>
    %18 = arith.addf %15, %17 : vector<128x16xf32>
    %cst_15 = arith.constant 0.000000e+00 : f32
    %19 = vector.broadcast %cst_15 : f32 to vector<128x16xf32>
    %20 = arith.maximumf %18, %19 : vector<128x16xf32>
    %c0_16 = arith.constant 0 : index
    %c0_17 = arith.constant 0 : index
    %21 = vector.load %arg7[%c0_16, %c0_17] : memref<8x16xbf16, #tpu.memory_space<vmem>>, vector<8x16xbf16>
    %22 = arith.truncf %20 : vector<128x16xf32> to vector<128x16xbf16>
    %cst_18 = arith.constant dense<0.000000e+00> : vector<8x128xf32>
    %23 = tpu.matmul %21, %22, %cst_18 {dimension_numbers = #tpu.dot_dimension_numbers<[1], [1], [0], [0], [0, 0, 1, 0], [], []>} : vector<8x16xbf16>, vector<128x16xbf16>, vector<8x128xf32> -> vector<8x128xf32>
    %24 = vector.extract_strided_slice %23 {offsets = [0, 0], sizes = [1, 128], strides = [1, 1]} : vector<8x128xf32> to vector<1x128xf32>
    %c0_19 = arith.constant 0 : index
    %c0_20 = arith.constant 0 : index
    %25 = vector.load %arg8[%c0_19, %c0_20] : memref<1x1xf32, #tpu.memory_space<vmem>>, vector<1x1xf32>
    %26 = vector.broadcast %25 : vector<1x1xf32> to vector<1x128xf32>
    %27 = arith.addf %24, %26 : vector<1x128xf32>
    %28 = math.absf %27 : vector<1x128xf32>
    %cst_21 = arith.constant 0.000000e+00 : f32
    %29 = vector.broadcast %cst_21 : f32 to vector<1x128xf32>
    %30 = arith.subf %29, %28 : vector<1x128xf32>
    %31 = math.exp %30 : vector<1x128xf32>
    %cst_22 = arith.constant 1.000000e+00 : f32
    %32 = vector.broadcast %cst_22 : f32 to vector<1x128xf32>
    %33 = arith.addf %32, %31 : vector<1x128xf32>
    %34 = tpu.reciprocal %33 {approx = true} : vector<1x128xf32> -> vector<1x128xf32>
    %cst_23 = arith.constant 0.000000e+00 : f32
    %35 = vector.broadcast %cst_23 : f32 to vector<1x128xf32>
    %36 = arith.cmpf oge, %27, %35 : vector<1x128xf32>
    %37 = arith.mulf %31, %34 : vector<1x128xf32>
    %38 = arith.select %36, %34, %37 : vector<1x128xi1>, vector<1x128xf32>
    %c0_24 = arith.constant 0 : index
    %c0_25 = arith.constant 0 : index
    %c0_26 = arith.constant 0 : index
    %39 = vector.load %arg9[%c0_24, %c0_25, %c0_26] : memref<1x1x128xf32, #tpu.memory_space<vmem>>, vector<1x1x128xf32>
    %40 = vector.shape_cast %39 : vector<1x1x128xf32> to vector<1x128xf32>
    %41 = vector.shape_cast %38 : vector<1x128xf32> to vector<1x1x128xf32>
    tpu.vector_store %arg9[%c0_24, %c0_25, %c0_26], %41 {strides = array<i32>} : memref<1x1x128xf32, #tpu.memory_space<vmem>>, vector<1x1x128xf32>,
    return
  }
  func.func @transform_0(%arg0: i32) -> (i32, i32) {
    %c0_i32 = arith.constant 0 : i32
    %c0_i32_0 = arith.constant 0 : i32
    return %arg0, %c0_i32 : i32, i32
  }
  func.func @transform_1(%arg0: i32) -> (i32, i32) {
    %c0_i32 = arith.constant 0 : i32
    %c0_i32_0 = arith.constant 0 : i32
    %c0_i32_1 = arith.constant 0 : i32
    return %c0_i32, %c0_i32_0 : i32, i32
  }
  func.func @transform_2(%arg0: i32) -> (i32, i32) {
    %c0_i32 = arith.constant 0 : i32
    %c0_i32_0 = arith.constant 0 : i32
    %c0_i32_1 = arith.constant 0 : i32
    return %c0_i32, %c0_i32_0 : i32, i32
  }
  func.func @transform_3(%arg0: i32) -> (i32, i32) {
    %c0_i32 = arith.constant 0 : i32
    %c0_i32_0 = arith.constant 0 : i32
    %c0_i32_1 = arith.constant 0 : i32
    return %c0_i32, %c0_i32_0 : i32, i32
  }
  func.func @transform_4(%arg0: i32) -> (i32, i32) {
    %c0_i32 = arith.constant 0 : i32
    %c0_i32_0 = arith.constant 0 : i32
    %c0_i32_1 = arith.constant 0 : i32
    return %c0_i32, %c0_i32_0 : i32, i32
  }
  func.func @transform_5(%arg0: i32) -> (i32, i32) {
    %c0_i32 = arith.constant 0 : i32
    %c0_i32_0 = arith.constant 0 : i32
    %c0_i32_1 = arith.constant 0 : i32
    return %c0_i32, %c0_i32_0 : i32, i32
  }
  func.func @transform_6(%arg0: i32) -> (i32, i32) {
    %c0_i32 = arith.constant 0 : i32
    %c0_i32_0 = arith.constant 0 : i32
    %c0_i32_1 = arith.constant 0 : i32
    return %c0_i32, %c0_i32_0 : i32, i32
  }
  func.func @transform_7(%arg0: i32) -> (i32, i32) {
    %c0_i32 = arith.constant 0 : i32
    %c0_i32_0 = arith.constant 0 : i32
    %c0_i32_1 = arith.constant 0 : i32
    return %c0_i32, %c0_i32_0 : i32, i32
  }
  func.func @transform_8(%arg0: i32) -> (i32, i32, i32) {
    %c0_i32 = arith.constant 0 : i32
    %c0_i32_0 = arith.constant 0 : i32
    %c0_i32_1 = arith.constant 0 : i32
    return %arg0, %c0_i32, %c0_i32_0 : i32, i32, i32
  }
}

</mosaic_0001>

<bundles_post_ra>
// kernel: tpu_custom_call.1
= control target key start
LH: loop header
LB: loop body
LE: loop exit
PB: predicated region body
PF: predicated region fallthrough
CT: control target
= control target key end

     0   :  { %s1582_s0 = inlined_call_operand.vmem [shape: bf16[512,32], index: 0, kind: input, shape index: {}]   ;;  %s1583_s1 = inlined_call_operand.vmem [shape: bf16[32,64], index: 1, kind: input, shape index: {}]   ;;  %s1584_s2 = inlined_call_operand.vmem [shape: bf16[64,32], index: 2, kind: input, shape index: {}]   ;;  %s1585_s3 = inlined_call_operand.vmem [shape: f32[1,32], index: 3, kind: input, shape index: {}]   ;;  %s1586_s4 = inlined_call_operand.vmem [shape: bf16[32,16], index: 4, kind: input, shape index: {}]   ;;  %s1587_s5 = inlined_call_operand.vmem [shape: f32[1,16], index: 5, kind: input, shape index: {}]   ;;  %s1588_s6 = inlined_call_operand.vmem [shape: bf16[8,16], index: 6, kind: input, shape index: {}]   ;;  %s1589_s7 = inlined_call_operand.<no memory space> [shape: f32[1,1], index: 7, kind: input, shape index: {}]   ;;  %s1590_s8 = inlined_call_operand.hbm [shape: f32[4,1,128], index: 8, kind: output, shape index: {}]  }
   0x1   :  { %v13_v0 = vstv %s1589_s7 }
   0x2   :  { %14 = vst [vmem:[#allocation2] sm:$0x1] %v13_v0 }
   0x3   :  { %15 = vsyncpa [#allocation4], 0 }
   0x4   :  { %17 = vsyncpa [#allocation4 + $0x1], 0  ;;  %s1391_s29 = smov 0   ;;  %s1393_s30 = smov 0  }
   0x5   :  { %s1395_s9 = smov 0   ;;  %s1397_s10 = smov 0  }
   0x6 LB: > { %s1036_s7 = sadd.s32 4294967295, %s1337_s10   ;;  %s1037_s11 = sadd.s32 4294967294, %s1337_s10   ;;  %s1337_s10 = sphi %s1397_s10, %s1596_s10   ;;  %s1333_s9 = sphi %s1395_s9, %s1595_s9   ;;  %s1329_s30 = sphi %s1393_s30, %s1594_s30   ;;  %s1325_s29 = sphi %s1391_s29, %s1593_s29  }
   0x7   : > { %s1414_s12 = sadd.s32 1, %s1337_s10   ;;  %s203_s13 = sadd.s32 1, %s1333_s9 }
   0x8   : > { %s200_s14 = ssub.s32 %s1337_s10, %s1414_s12  ;;  %p213_p0 = scmp.ne.s32.totalorder %s1333_s9, %s1329_s30 }
   0x9   : > { %p201_p1 = scmp.eq.s32.totalorder %s200_s14, 0  ;;  %p214_p2 = scmp.eq.s32.totalorder %s1036_s7, 3 }
   0xa   : > { %p219_p3 = scmp.ne.s32.totalorder %s1329_s30, %s1325_s29  ;;  %p220_p4 = scmp.eq.s32.totalorder %s1037_s11, 3 }
   0xb   : > { %s1424_s15 = scalar_select %p201_p1, %s1333_s9, %s203_s13  }
   0xc   : > { %p1426_p5 = por %p214_p2, %p213_p0  ;;  %p1430_p6 = por %p220_p4, %p219_p3 }
   0xd   : > { %p1040_p7 = scmp.ge.s32.totalorder %s1337_s10, 1  ;;  %p268_p8 = scmp.lt.s32.totalorder %s1337_s10, 5 }
   0xf   : > { %p269_p9 = pnand %p1040_p7, %p268_p8 }
  0x10   : > { %s1439_s20 = sshll.u32 (!%p269_p9), %s1036_s7, 4  ;;  %s299_s14 = sand.u32 (!%p269_p9), 1, %s1329_s30  }
  0x11   : > { %272 = sbr.rel (%p269_p9) target bundleno = 979 (0x3d3), region = 52  ;;  %p302_p10 = scmp.lt.s32.totalorder (!%p269_p9), %s1439_s20, 63 }
  0x12   : > { %s300_s18 = scalar_lea.vmem (!%p269_p9), [#allocation3], %s299_s14  ;;  %s1547_s23 = scalar_lea.hbm (!%p269_p9), %s1590_s8, %s1439_s20 }
  0x13   : > { %s982_s19 = sshll.u32 (!%p269_p9), %s300_s18, 4  ;;  %s970_s24 = scalar_lea.sflag (!%p269_p9), [#allocation4], %s299_s14  ;;  %s983_s19 = int_to_ptr.vmem [resolvable:$true] %s982_s19 }
  0x16   : > { %v1257_v1 = vld [vmem:[%s1583_s1 + $0x8] sm:$0xff]   ;;  %v1258_v2 = vld [vmem:[%s1583_s1] sm:$0xff]   ;;  %v1267_v3 = vld [vmem:[%s1584_s2 + $0x18] sm:$0xff]   ;;  %s303_s25 = scalar_select %p302_p10, %s1439_s20, 63  ;;  %vm380_vm0 = vcmask 261120   ;;  %vm565_vm1 = vcmask 523264  }
  0x17   : > { %1130 = vmatprep.subr.bf16.mxu0 %v1257_v1  ;;  %1150 = vmatprep.subr.bf16.mxu1 %v1267_v3  ;;  %v1268_v12 = vld [vmem:[%s1584_s2 + $0x10] sm:$0xff]   ;;  %v1269_v13 = vld [vmem:[%s1584_s2 + $0x8] sm:$0xff]   ;;  %v1270_v14 = vld [vmem:[%s1584_s2] sm:$0xff]   ;;  %vm1340_vm2 = vmmov 0   ;;  %vm880_vm3 = vcmask 130048  }
  0x18   : > { %1131 = vmatpush3.bf16.msra.mxu0 %v1257_v1  ;;  %s1042_s26 = sshll.u32 %s303_s25, 2  ;;  %1151 = vmatpush3.bf16.msra.mxu1 %v1267_v3  ;;  %v1271_v15 = vld [vmem:[%s1586_s4 + $0x8] sm:$0xff]   ;;  %v1272_v16 = vld [vmem:[%s1586_s4] sm:$0xff]   ;;  %s1277_s25 = scalar_lea.vmem %s983_s19, 16 }
  0x19   : > { %1132 = vmatprep.subr.bf16.mxu0 %v1258_v2  ;;  %s305_s7 = scalar_lea.vmem %s1582_s0, %s1042_s26  ;;  %1152 = vmatprep.subr.bf16.mxu1 %v1268_v12  ;;  %v1061_v59 = vld [vmem:[%s1585_s3] ss:$0 sm:$0xff]  ;;  %p1278_p11 = scmp.ne.s32.totalorder %s983_s19, %s1277_s25 }
  0x1a   : > { %v1259_v4 = vld [vmem:[%s305_s7] sm:$0xff]   ;;  %v1260_v5 = vld [vmem:[%s305_s7 + $0x8] sm:$0xff]   ;;  %v1261_v6 = vld [vmem:[%s305_s7 + $0x10] sm:$0xff]   ;;  %s1342_s26 = smov [#allocation3]  }
  0x1b   : > { %1134 = vmatprep.mubr.msk.bf16.mxu0 %vm380_vm0, %v1259_v4  ;;  %v1262_v7 = vld [vmem:[%s305_s7 + $0x18] sm:$0xff]   ;;  %v1263_v8 = vld [vmem:[%s305_s7 + $0x20] sm:$0xff]   ;;  %v1264_v9 = vld [vmem:[%s305_s7 + $0x28] sm:$0xff]   ;;  %p1279_p12 = pnand %p1278_p11, %p1426_p5  ;;  %s1281_s27 = sshll.u32 %s1342_s26, 4  ;;  %s1282_s27 = int_to_ptr.vmem [resolvable:$false] %s1281_s27 }
  0x1c   : > { %1133 = vmatpush3.bf16.msra.mxu0 %v1258_v2  ;;  %v1265_v10 = vld [vmem:[%s305_s7 + $0x30] sm:$0xff]   ;;  %v1266_v11 = vld [vmem:[%s305_s7 + $0x38] sm:$0xff]   ;;  %1153 = vmatpush3.bf16.msra.mxu1 %v1268_v12  ;;  %s1283_s28 = scalar_lea.vmem %s1282_s27, 32  ;;  %p1284_p0 = scmp.lt.s32.totalorder %s983_s19, %s1282_s27 }
  0x1d   : > { %1154 = vmatprep.subr.bf16.mxu1 %v1269_v13  ;;  %1174 = vmatprep.subr.bf16.mxu0 %v1271_v15  ;;  %p1280_p13 = pneg %p1279_p12  ;;  %p1285_p1 = scmp.lt.s32.totalorder %s1283_s28, %s1277_s25 }
  0x1f   : > { %1135 = vmatmul.mubr.msk.bf16.vlgmr.msra.gmra.mxu0 %vm380_vm0, %v1260_v5  ;;  %p1286_p2 = por %p1285_p1, %p1284_p0 }
  0x20   : > { %1138 = vmatprep.mubr.msk.bf16.mxu0 %vm380_vm0, %v1261_v6  ;;  %1155 = vmatpush3.bf16.msra.mxu1 %v1269_v13 }
  0x21   : > { %1156 = vmatprep.subr.bf16.mxu1 %v1270_v14  ;;  %1175 = vmatpush3.bf16.msra.mxu0 %v1271_v15  ;;  %p1287_p3 = pnand %p1286_p2, %p1280_p13 }
  0x22   : > { %1176 = vmatprep.subr.bf16.mxu0 %v1272_v16 }
  0x24   : > { %1157 = vmatpush3.bf16.msra.mxu1 %v1270_v14 }
  0x25   : > { %1177 = vmatpush3.bf16.msra.mxu0 %v1272_v16 }
  0x27   : > { %1139 = vmatmul.mubr.msk.bf16.gmra.mxu0 %vm380_vm0, %v1262_v7 }
  0x28   : > { %1142 = vmatprep.mubr.msk.bf16.mxu0 %vm380_vm0, %v1263_v8 }
  0x2f   : > { %1143 = vmatmul.mubr.msk.bf16.gmra.mxu0 %vm380_vm0, %v1264_v9 }
  0x30   : > { %1146 = vmatprep.mubr.msk.bf16.mxu0 %vm380_vm0, %v1265_v10 }
  0x37   : > { %1147 = vmatmul.mubr.msk.bf16.gmra.mxu0 %vm380_vm0, %v1266_v11 }
  0xdf   : > { %v1136_v17 = vpop.f32.mrf.mxu0 }
  0xe0   : > { %v504_v24 = vmax.f32 %v1136_v17, 0.0 }
  0xe1   : > { %v439_v18 = vpop.f32.mrf.mxu0 }
  0xe2   : > { %v502_v22 = vmax.f32 %v439_v18, 0.0 }
  0xe3   : > { %v1137_v19 = vpop.f32.mrf.mxu0 }
  0xe4   : > { %v505_v20 = vmax.f32 %v1137_v19, 0.0 }
  0xe5   : > { %v442_v21 = vpop.f32.mrf.mxu0 }
  0xe6   : > { %v503_v23 = vmax.f32 %v442_v21, 0.0  ;;  %v519_v27 = vpack.c.bf16 %v505_v20, %v504_v24 }
  0xe7   : > { %v1140_v25 = vpop.f32.mrf.mxu0 }
  0xe8   : > { %v518_v26 = vpack.c.bf16 %v503_v23, %v502_v22  ;;  %v508_v34 = vmax.f32 %v1140_v25, 0.0 }
  0xe9   : > { %v455_v28 = vpop.f32.mrf.mxu0 }
  0xea   : > { %1158 = vmatprep.mubr.msk.bf16.mxu1 %vm565_vm1, %v518_v26  ;;  %v506_v32 = vmax.f32 %v455_v28, 0.0 }
  0xeb   : > { %v1141_v29 = vpop.f32.mrf.mxu0  ;;  %1159 = vmatmul.mubr.msk.bf16.vlgmr.msra.gmra.mxu1 %vm565_vm1, %v519_v27 }
  0xec   : > { %v509_v30 = vmax.f32 %v1141_v29, 0.0 }
  0xed   : > { %v458_v31 = vpop.f32.mrf.mxu0 }
  0xee   : > { %v507_v33 = vmax.f32 %v458_v31, 0.0  ;;  %v521_v37 = vpack.c.bf16 %v509_v30, %v508_v34 }
  0xef   : > { %v1144_v35 = vpop.f32.mrf.mxu0 }
  0xf0   : > { %v520_v36 = vpack.c.bf16 %v507_v33, %v506_v32  ;;  %v512_v44 = vmax.f32 %v1144_v35, 0.0 }
  0xf1   : > { %v471_v38 = vpop.f32.mrf.mxu0 }
  0xf2   : > { %1162 = vmatprep.mubr.msk.bf16.mxu1 %vm565_vm1, %v520_v36  ;;  %v510_v42 = vmax.f32 %v471_v38, 0.0 }
  0xf3   : > { %v1145_v39 = vpop.f32.mrf.mxu0  ;;  %1163 = vmatmul.mubr.msk.bf16.gmra.mxu1 %vm565_vm1, %v521_v37 }
  0xf4   : > { %v513_v40 = vmax.f32 %v1145_v39, 0.0 }
  0xf5   : > { %v474_v41 = vpop.f32.mrf.mxu0 }
  0xf6   : > { %v511_v43 = vmax.f32 %v474_v41, 0.0  ;;  %v523_v47 = vpack.c.bf16 %v513_v40, %v512_v44 }
  0xf7   : > { %v1148_v45 = vpop.f32.mrf.mxu0 }
  0xf8   : > { %v522_v46 = vpack.c.bf16 %v511_v43, %v510_v42  ;;  %v516_v54 = vmax.f32 %v1148_v45, 0.0 }
  0xf9   : > { %v487_v48 = vpop.f32.mrf.mxu0 }
  0xfa   : > { %1166 = vmatprep.mubr.msk.bf16.mxu1 %vm565_vm1, %v522_v46  ;;  %v514_v52 = vmax.f32 %v487_v48, 0.0 }
  0xfb   : > { %v1149_v49 = vpop.f32.mrf.mxu0  ;;  %1167 = vmatmul.mubr.msk.bf16.gmra.mxu1 %vm565_vm1, %v523_v47 }
  0xfc   : > { %v517_v50 = vmax.f32 %v1149_v49, 0.0 }
  0xfd   : > { %v490_v51 = vpop.f32.mrf.mxu0 }
  0xfe   : > { %v515_v53 = vmax.f32 %v490_v51, 0.0  ;;  %v525_v56 = vpack.c.bf16 %v517_v50, %v516_v54  ;;  %v1339_v50 = vmov 0.0   ;;  %v948_v51 = vld [vmem:[#allocation2] sm:$0x1] }
  0xff   : > { %1194 = vmatprep.subr.bf16.mxu1 %v1339_v50  ;;  %v1499_v54 = vld [vmem:[%s1587_s5] ss:$0 sm:$0xff] }
 0x100   : > { %v524_v55 = vpack.c.bf16 %v515_v53, %v514_v52  ;;  %v1341_v52 = vmov 0  }
 0x101   : > { %1256 = vset.pattern.permute.xlu0 %v1341_v52 }
 0x102   : > { %1170 = vmatprep.mubr.msk.bf16.mxu1 %vm565_vm1, %v524_v55  ;;  %951 = vperm.xlu0 %1256, %v948_v51  }
 0x103   : > { %1171 = vmatmul.mubr.msk.bf16.gmra.mxu1 %vm565_vm1, %v525_v56 }
 0x104   : > { %1210 = vmatprep.mubr.msk.bf16.mxu1 %vm1340_vm2, %v1339_v50 }
 0x1ab   : > { %v1160_v57 = vpop.f32.mrf.mxu1 }
 0x1ac   : > { %v633_v63 = vadd.f32 %v1160_v57, %v1061_v59 }
 0x1ad   : > { %v624_v58 = vpop.f32.mrf.mxu1 }
 0x1ae   : > { %v625_v61 = vadd.f32 %v1061_v59, %v624_v58  ;;  %v689_v6 = vmax.f32 %v633_v63, 0.0 }
 0x1af   : > { %v1161_v60 = vpop.f32.mrf.mxu1 }
 0x1b0   : > { %v636_v62 = vadd.f32 %v1161_v60, %v1061_v59  ;;  %v687_v4 = vmax.f32 %v625_v61, 0.0 }
 0x1b1   : > { %v627_v0 = vpop.f32.mrf.mxu1 }
 0x1b2   : > { %v628_v1 = vadd.f32 %v1061_v59, %v627_v0  ;;  %v690_v2 = vmax.f32 %v636_v62, 0.0 }
 0x1b3   : > { %v1164_v3 = vpop.f32.mrf.mxu1 }
 0x1b4   : > { %v688_v5 = vmax.f32 %v628_v1, 0.0  ;;  %v704_v9 = vpack.c.bf16 %v690_v2, %v689_v6  ;;  %v649_v13 = vadd.f32 %v1164_v3, %v1061_v59 }
 0x1b5   : > { %v640_v7 = vpop.f32.mrf.mxu1 }
 0x1b6   : > { %v703_v8 = vpack.c.bf16 %v688_v5, %v687_v4  ;;  %v641_v11 = vadd.f32 %v1061_v59, %v640_v7  ;;  %v693_v20 = vmax.f32 %v649_v13, 0.0 }
 0x1b7   : > { %v1165_v10 = vpop.f32.mrf.mxu1 }
 0x1b8   : > { %v652_v12 = vadd.f32 %v1165_v10, %v1061_v59  ;;  %1178 = vmatprep.mubr.msk.bf16.mxu0 %vm380_vm0, %v703_v8  ;;  %v691_v18 = vmax.f32 %v641_v11, 0.0 }
 0x1b9   : > { %v643_v14 = vpop.f32.mrf.mxu1  ;;  %1179 = vmatmul.mubr.msk.bf16.vlgmr.msra.gmra.mxu0 %vm380_vm0, %v704_v9 }
 0x1ba   : > { %v644_v15 = vadd.f32 %v1061_v59, %v643_v14  ;;  %v694_v16 = vmax.f32 %v652_v12, 0.0 }
 0x1bb   : > { %v1168_v17 = vpop.f32.mrf.mxu1 }
 0x1bc   : > { %v692_v19 = vmax.f32 %v644_v15, 0.0  ;;  %v706_v23 = vpack.c.bf16 %v694_v16, %v693_v20  ;;  %v665_v27 = vadd.f32 %v1168_v17, %v1061_v59 }
 0x1bd   : > { %v656_v21 = vpop.f32.mrf.mxu1 }
 0x1be   : > { %v705_v22 = vpack.c.bf16 %v692_v19, %v691_v18  ;;  %v657_v25 = vadd.f32 %v1061_v59, %v656_v21  ;;  %v697_v34 = vmax.f32 %v665_v27, 0.0 }
 0x1bf   : > { %v1169_v24 = vpop.f32.mrf.mxu1 }
 0x1c0   : > { %v668_v26 = vadd.f32 %v1169_v24, %v1061_v59  ;;  %1182 = vmatprep.mubr.msk.bf16.mxu0 %vm380_vm0, %v705_v22  ;;  %v695_v32 = vmax.f32 %v657_v25, 0.0 }
 0x1c1   : > { %v659_v28 = vpop.f32.mrf.mxu1  ;;  %1183 = vmatmul.mubr.msk.bf16.gmra.mxu0 %vm380_vm0, %v706_v23 }
 0x1c2   : > { %v660_v29 = vadd.f32 %v1061_v59, %v659_v28  ;;  %v698_v30 = vmax.f32 %v668_v26, 0.0 }
 0x1c3   : > { %v1172_v31 = vpop.f32.mrf.mxu1 }
 0x1c4   : > { %v696_v33 = vmax.f32 %v660_v29, 0.0  ;;  %v708_v37 = vpack.c.bf16 %v698_v30, %v697_v34  ;;  %v681_v41 = vadd.f32 %v1172_v31, %v1061_v59 }
 0x1c5   : > { %v672_v35 = vpop.f32.mrf.mxu1 }
 0x1c6   : > { %v707_v36 = vpack.c.bf16 %v696_v33, %v695_v32  ;;  %v673_v39 = vadd.f32 %v1061_v59, %v672_v35  ;;  %v701_v47 = vmax.f32 %v681_v41, 0.0 }
 0x1c7   : > { %v1173_v38 = vpop.f32.mrf.mxu1 }
 0x1c8   : > { %v684_v40 = vadd.f32 %v1173_v38, %v1061_v59  ;;  %1186 = vmatprep.mubr.msk.bf16.mxu0 %vm380_vm0, %v707_v36  ;;  %v699_v45 = vmax.f32 %v673_v39, 0.0 }
 0x1c9   : > { %v675_v42 = vpop.f32.mrf.mxu1  ;;  %1187 = vmatmul.mubr.msk.bf16.gmra.mxu0 %vm380_vm0, %v708_v37 }
 0x1ca   : > { %v676_v43 = vadd.f32 %v1061_v59, %v675_v42  ;;  %v702_v44 = vmax.f32 %v684_v40, 0.0 }
 0x1cc   : > { %v700_v46 = vmax.f32 %v676_v43, 0.0  ;;  %v710_v49 = vpack.c.bf16 %v702_v44, %v701_v47 }
 0x1ce   : > { %v709_v48 = vpack.c.bf16 %v700_v46, %v699_v45 }
 0x1d0   : > { %1190 = vmatprep.mubr.msk.bf16.mxu0 %vm380_vm0, %v709_v48 }
 0x1d1   : > { %1191 = vmatmul.mubr.msk.bf16.gmra.mxu0 %vm380_vm0, %v710_v49 }
 0x279   : > { %v1180_v53 = vpop.f32.mrf.mxu0 }
 0x27a   : > { %v801_v56 = vadd.f32 %v1180_v53, %v1499_v54 }
 0x27b   : > { %v792_v55 = vpop.f32.mrf.mxu0 }
 0x27c   : > { %v793_v58 = vadd.f32 %v1499_v54, %v792_v55  ;;  %v857_v61 = vmax.f32 %v801_v56, 0.0  ;;  %v871_v55 = vld [vmem:[%s1588_s6] sm:$0xf]  ;;  %v954_v56 = vlaneseq }
 0x27d   : > { %v1181_v57 = vpop.f32.mrf.mxu0 }
 0x27e   : > { %v804_v59 = vadd.f32 %v1181_v57, %v1499_v54  ;;  %v855_v1 = vmax.f32 %v793_v58, 0.0  ;;  %v955_v57 = vshrl.u32 %v954_v56, 7 }
 0x27f   : > { %v795_v60 = vpop.f32.mrf.mxu0 }
 0x280   : > { %v858_v62 = vmax.f32 %v804_v59, 0.0  ;;  %v796_v63 = vadd.f32 %v1499_v54, %v795_v60  ;;  %v956_v58 = vsub.s32 0, %v955_v57  ;;  %v952_v59 = vpop.permute.xlu0 %951 }
 0x281   : > { %v1184_v0 = vpop.f32.mrf.mxu0 }
 0x282   : > { %v1505_v2 = vpack.c.bf16 %v858_v62, %v857_v61  ;;  %v856_v3 = vmax.f32 %v796_v63, 0.0  ;;  %v817_v40 = vadd.f32 %v1184_v0, %v1499_v54  ;;  %v957_v60 = vrot.slane %v952_v59, %v956_v58 }
 0x283   : > { %v808_v4 = vpop.f32.mrf.mxu0 }
 0x284   : > { %v1507_v5 = vpack.c.bf16 %v856_v3, %v855_v1  ;;  %v861_v43 = vmax.f32 %v817_v40, 0.0  ;;  %v809_v46 = vadd.f32 %v1499_v54, %v808_v4  ;;  %v888_v53 = vsel %vm880_vm3, %v1505_v2, 0 }
 0x285   : > { %v1185_v6 = vpop.f32.mrf.mxu0 }
 0x286   : > { %v820_v38 = vadd.f32 %v1185_v6, %v1499_v54  ;;  %v859_v49 = vmax.f32 %v809_v46, 0.0 }
 0x287   : > { %v811_v7 = vpop.f32.mrf.mxu0 }
 0x288   : > { %v862_v41 = vmax.f32 %v820_v38, 0.0  ;;  %v812_v45 = vadd.f32 %v1499_v54, %v811_v7 }
 0x289   : > { %v1188_v8 = vpop.f32.mrf.mxu0 }
 0x28a   : > { %v833_v28 = vadd.f32 %v1188_v8, %v1499_v54  ;;  %v875_v44 = vpack.c.bf16 %v862_v41, %v861_v43  ;;  %v860_v47 = vmax.f32 %v812_v45, 0.0 }
 0x28b   : > { %v824_v9 = vpop.f32.mrf.mxu0 }
 0x28c   : > { %v865_v31 = vmax.f32 %v833_v28, 0.0  ;;  %v825_v34 = vadd.f32 %v1499_v54, %v824_v9  ;;  %v894_v48 = vsel %vm880_vm3, %v875_v44, 0  ;;  %v874_v51 = vpack.c.bf16 %v860_v47, %v859_v49 }
 0x28d   : > { %v1189_v10 = vpop.f32.mrf.mxu0 }
 0x28e   : > { %v836_v26 = vadd.f32 %v1189_v10, %v1499_v54  ;;  %v863_v37 = vmax.f32 %v825_v34, 0.0  ;;  %v891_v52 = vsel %vm880_vm3, %v874_v51, 0 }
 0x28f   : > { %v827_v11 = vpop.f32.mrf.mxu0 }
 0x290   : > { %v866_v29 = vmax.f32 %v836_v26, 0.0  ;;  %v828_v33 = vadd.f32 %v1499_v54, %v827_v11 }
 0x291   : > { %v1192_v12 = vpop.f32.mrf.mxu0 }
 0x292   : > { %v849_v14 = vadd.f32 %v1192_v12, %v1499_v54  ;;  %v877_v32 = vpack.c.bf16 %v866_v29, %v865_v31  ;;  %v864_v35 = vmax.f32 %v828_v33, 0.0 }
 0x293   : > { %v840_v13 = vpop.f32.mrf.mxu0 }
 0x294   : > { %v869_v18 = vmax.f32 %v849_v14, 0.0  ;;  %v841_v21 = vadd.f32 %v1499_v54, %v840_v13  ;;  %v900_v36 = vsel %vm880_vm3, %v877_v32, 0  ;;  %v876_v39 = vpack.c.bf16 %v864_v35, %v863_v37 }
 0x295   : > { %v1193_v15 = vpop.f32.mrf.mxu0 }
 0x296   : > { %v852_v16 = vadd.f32 %v1193_v15, %v1499_v54  ;;  %v867_v25 = vmax.f32 %v841_v21, 0.0  ;;  %v897_v42 = vsel %vm880_vm3, %v876_v39, 0 }
 0x297   : > { %v843_v17 = vpop.f32.mrf.mxu0 }
 0x298   : > { %v870_v19 = vmax.f32 %v852_v16, 0.0  ;;  %v844_v20 = vadd.f32 %v1499_v54, %v843_v17  ;;  %v885_v54 = vsel %vm880_vm3, %v1507_v5, 0 }
 0x29a   : > { %v879_v22 = vpack.c.bf16 %v870_v19, %v869_v18  ;;  %v868_v23 = vmax.f32 %v844_v20, 0.0 }
 0x29c   : > { %v906_v24 = vsel %vm880_vm3, %v879_v22, 0  ;;  %v878_v27 = vpack.c.bf16 %v868_v23, %v867_v25 }
 0x29d   : > { %1195 = vmatpush3.bf16.xpose.msra.mxu1 %v906_v24 }
 0x29e   : > { %1196 = vmatprep.subr.bf16.mxu1 %v1339_v50  ;;  %v903_v30 = vsel %vm880_vm3, %v878_v27, 0 }
 0x2a5   : > { %1197 = vmatpush3.bf16.xpose.msra.mxu1 %v903_v30 }
 0x2a6   : > { %1198 = vmatprep.subr.bf16.mxu1 %v1339_v50 }
 0x2ad   : > { %1199 = vmatpush3.bf16.xpose.msra.mxu1 %v900_v36 }
 0x2ae   : > { %1200 = vmatprep.subr.bf16.mxu1 %v1339_v50 }
 0x2b5   : > { %1201 = vmatpush3.bf16.xpose.msra.mxu1 %v897_v42 }
 0x2b6   : > { %1202 = vmatprep.subr.bf16.mxu1 %v1339_v50 }
 0x2bd   : > { %1203 = vmatpush3.bf16.xpose.msra.mxu1 %v894_v48 }
 0x2be   : > { %1204 = vmatprep.subr.bf16.mxu1 %v1339_v50 }
 0x2c5   : > { %1205 = vmatpush3.bf16.xpose.msra.mxu1 %v891_v52 }
 0x2c6   : > { %1206 = vmatprep.subr.bf16.mxu1 %v1339_v50 }
 0x2cd   : > { %1207 = vmatpush3.bf16.xpose.msra.mxu1 %v888_v53 }
 0x2ce   : > { %1208 = vmatprep.subr.bf16.mxu1 %v1339_v50 }
 0x2d5   : > { %1209 = vmatpush3.bf16.xpose.msra.mxu1 %v885_v54 }
 0x2dc   : > { %1211 = vmatmul.mubr.msk.bf16.vlgmr.msra.gmra.mxu1 %vm880_vm3, %v871_v55 }
 0x39c   : > { %v942_v61 = vpop.f32.mrf.mxu1 }
 0x39d   : > { %v958_v62 = vadd.f32 %v957_v60, %v942_v61 }
 0x39e   : > { %v1212_v63 = vpop.f32.mrf.mxu1 }
 0x39f   : > { %v959_v50 = vand.u32 2147483647, %v958_v62  ;;  %vm965_vm4 = vcmp.ge.f32.partialorder %v958_v62, 0.0 }
 0x3a0   : > { %v945_v0 = vpop.f32.mrf.mxu1 }
 0x3a1   : > { %v960_v1 = vsub.f32 0.0, %v959_v50 }
 0x3a2   : > { %v1213_v2 = vpop.f32.mrf.mxu1 }
 0x3a3   : > { %v961_v3 = vmul.f32 1.442695, %v960_v1 }
 0x3a5   : > { %1273 = vpow2.f32 %v961_v3 }
 0x3b2   : > { %v1274_v4 = vpop.eup %1273 }
 0x3b3   : > { %v963_v5 = vadd.f32 1.0, %v1274_v4 }
 0x3b5   : > { %1275 = vrcp.f32 %v963_v5 }
 0x3c2   : > { %v1276_v6 = vpop.eup %1275 }
 0x3c3   : > { %v966_v7 = vmul.f32 %v1276_v6, %v1274_v4 }
 0x3c5   : > { %v967_v8 = vsel %vm965_vm4, %v1276_v6, %v966_v7 }
 0x3c6   : > { %968 = vst [vmem:[%s300_s18] sm:$0x1] %v967_v8 }
 0x3c7   : > { %1290 = shalt.err (!%p1287_p3)
}
 0x3c8   : > { %s1291_s20 = scalar_lea.hbm %s1547_s23, 16  ;;  %s1295_s13 = scalar_lea.hbm %s1590_s8, 64 }
 0x3c9   : > { %p1292_p4 = scmp.ne.s32.totalorder %s1547_s23, %s1291_s20  ;;  %p1296_p9 = scmp.lt.s32.totalorder %s1547_s23, %s1590_s8 }
 0x3ca   : > { %p1297_p10 = scmp.lt.s32.totalorder %s1295_s13, %s1291_s20 }
 0x3cb   : > { %p1293_p7 = pnand %p1292_p4, %p1426_p5 }
 0x3cc   : > { %p1298_p11 = por %p1297_p10, %p1296_p9 }
 0x3cd   : > { %p1294_p8 = pneg %p1293_p7 }
 0x3cf   : > { %p1299_p12 = pnand %p1298_p11, %p1294_p8 }
 0x3d1   : > { %1302 = shalt.err (!%p1299_p12)
}
 0x3d2   : > { %1214 = dma.vmem_to_hbm [thread:$0]  (%p1426_p5), %s983_s19, 16, %s1547_s23, %s970_s24  }
 0x3d3 PF: > { %p1220_p13 = scmp.ge.s32.totalorder %s1337_s10, 2  ;;  %s994_s21 = sand.u32 1, %s1325_s29  }
 0x3d4   : > { %s995_s22 = scalar_lea.sflag [#allocation4], %s994_s21 }
 0x3d5   : > { %p1217_p0 = pnand %p1220_p13, %p1430_p6 }
 0x3d7   : > { %p1218_p1 = pneg %p1217_p0 }
 0x3d9   : > { %1320 = dma.done.wait (%p1218_p1), %s995_s22, 16  }
 0x3da   : > { %1322 = vsyncadd (%p1218_p1), %s995_s22, 4294967280  ;;  %p20_p2 = scmp.ge.s32.totalorder %s1414_s12, 6   ;;  %s1593_s29 = smov %s1329_s30 }
 0x3db   : > { %s1594_s30 = smov %s1333_s9  ;;  %s1595_s9 = smov %s1424_s15 }
 0x3dc   : > { %s1596_s10 = smov %s1414_s12  ;;  %22 = sbr.rel (!%p20_p2) target bundleno = 6 (0x6), region = 87 }
 0x3e1   :  { %999 = vsyncpa [#allocation4], 1 }
 0x3e2   :  { %1001 = vsyncpa [#allocation4 + $0x1], 1 }

</bundles_post_ra>
